<compile_context>
chip_gen: v7x
topology: tpu7x:2x2x1
jax: 0.10.0
libtpu: 0.0.40
codegen_flags: <defaults>
</compile_context>

<pallas_src>
import jax
import jax.numpy as jnp
from jax import lax
from jax.experimental import pallas as pl
from jax.experimental.pallas import tpu as pltpu

BN_EPS = 1e-5


def _build_kernels(N, C, H, W):
    """Build the two kernels closed over static geometry."""
    HW = H * W
    inv_count = 1.0 / float(N * HW)

    def conv3x3(xp_ref, w_ref, mask_ref):
        # xp_ref : (C, (H+2)*W + 2)  H-padded, flattened image (+1 guard each end)
        # w_ref  : (9, Cout, Cin)    tap-major, transposed conv2 weights
        # mask_ref: (2, HW) f32      row 0: w>=1 mask, row 1: w<=W-2 mask
        mask_l = mask_ref[0:1, :]
        mask_r = mask_ref[1:2, :]
        acc = jnp.zeros((C, HW), jnp.float32)
        for dy in range(3):
            for dx in range(3):
                s = dy * W + dx                      # static lane offset of this tap
                slab = xp_ref[:, s:s + HW]           # (C, HW)
                if dx == 0:
                    slab = slab * mask_l             # zero out-of-image left column
                elif dx == 2:
                    slab = slab * mask_r             # zero out-of-image right column
                acc = acc + jnp.dot(w_ref[dy * 3 + dx], slab,
                                    preferred_element_type=jnp.float32)
        return acc                                   # (Cout, HW) f32

    def stats_kernel(xp_ref, w_ref, mask_ref, stats_ref):
        # Pass 1: accumulate per-channel sum and sum-of-squares of conv2(x)
        # over the whole batch (global BN statistics).
        @pl.when(pl.program_id(0) == 0)
        def _():
            stats_ref[...] = jnp.zeros_like(stats_ref)

        conv = conv3x3(xp_ref, w_ref, mask_ref)
        stats_ref[:, 0:1] += jnp.sum(conv, axis=1, keepdims=True)
        stats_ref[:, 1:2] += jnp.sum(conv * conv, axis=1, keepdims=True)

    def norm_kernel(xp_ref, w_ref, mask_ref, g_ref, b_ref, stats_ref, o_ref):
        # Pass 2: recompute conv tile, apply BN with global stats, add residual.
        conv = conv3x3(xp_ref, w_ref, mask_ref)
        mean = stats_ref[:, 0:1] * inv_count                 # (C,1)
        var = stats_ref[:, 1:2] * inv_count - mean * mean    # (C,1), one-pass form
        scale = g_ref[...] * lax.rsqrt(var + BN_EPS)         # (C,1)
        shift = b_ref[...] - mean * scale                    # (C,1)
        res = xp_ref[:, W + 1:W + 1 + HW]                    # residual x, (C, HW)
        o_ref[...] = res + conv * scale + shift

    return stats_kernel, norm_kernel


def resblk_forward(x_nchw, params):
    N, C, H, W = x_nchw.shape
    HW = H * W
    Lp = (H + 2) * W + 2

    w2 = params["w2"]                          # (9, Cin, Cout), tap = dy*3+dx
    Cout = w2.shape[-1]
    assert C == w2.shape[1] == Cout, "ResBlk.forward only runs with ch_in == ch_out"

    # ---- host-side prep: cheap pad + reshape only (no im2col expansion) ----
    x = x_nchw.astype(jnp.float32)
    xp = jnp.pad(x, ((0, 0), (0, 0), (1, 1), (0, 0)))            # pad H: (N,C,H+2,W)
    xp = xp.reshape(N, C, (H + 2) * W)
    xp = jnp.pad(xp, ((0, 0), (0, 0), (1, 1)))                   # (N, C, Lp)

    w2t = jnp.transpose(w2, (0, 2, 1)).astype(jnp.float32)       # (9, Cout, Cin)
    g2 = params["g2"].reshape(Cout, 1).astype(jnp.float32)
    beta2 = params["beta2"].reshape(Cout, 1).astype(jnp.float32)
    # b2 is intentionally not passed: BN mean subtraction cancels the conv bias.

    wcol = jnp.arange(HW, dtype=jnp.int32) % W
    mask = jnp.stack([(wcol >= 1), (wcol <= W - 2)]).astype(jnp.float32)  # (2, HW)

    stats_kernel, norm_kernel = _build_kernels(N, C, H, W)

    xp_spec = pl.BlockSpec((None, C, Lp), lambda n: (n, 0, 0))
    w_spec = pl.BlockSpec((9, Cout, C), lambda n: (0, 0, 0))
    mask_spec = pl.BlockSpec((2, HW), lambda n: (0, 0))
    vec_spec = pl.BlockSpec((Cout, 1), lambda n: (0, 0))
    stats_spec = pl.BlockSpec((Cout, 2), lambda n: (0, 0))
    out_spec = pl.BlockSpec((None, Cout, HW), lambda n: (n, 0, 0))

    # per-step VMEM footprint (x block, conv/out block, weights, masks, stats) with
    # double-buffering headroom; comfortably under scoped VMEM on v5e/v6e/v7x.
    blk_bytes = 4 * (C * Lp + Cout * HW + 9 * Cout * C + 2 * HW + 4 * Cout)
    vmem_limit = int(min(32 * 1024 * 1024, max(2 * 1024 * 1024, 8 * blk_bytes)))

    # ---- pass 1: global per-channel sum / sumsq of conv2(x) ----
    stats = pl.pallas_call(
        stats_kernel,
        out_shape=jax.ShapeDtypeStruct((Cout, 2), jnp.float32),
        grid=(N,),
        in_specs=[xp_spec, w_spec, mask_spec],
        out_specs=stats_spec,
        compiler_params=pltpu.CompilerParams(
            dimension_semantics=("arbitrary",),      # stats output is a reduction
            vmem_limit_bytes=vmem_limit),
    )(xp, w2t, mask)

    # ---- pass 2: normalize with global stats + residual add ----
    out_flat = pl.pallas_call(
        norm_kernel,
        out_shape=jax.ShapeDtypeStruct((N, Cout, HW), jnp.float32),
        grid=(N,),
        in_specs=[xp_spec, w_spec, mask_spec, vec_spec, vec_spec, stats_spec],
        out_specs=out_spec,
        compiler_params=pltpu.CompilerParams(
            dimension_semantics=("parallel",),       # independent per image (megacore)
            vmem_limit_bytes=vmem_limit),
    )(xp, w2t, mask, g2, beta2, stats)

    return out_flat.reshape(N, Cout, H, W)


def resblk_reference(x_nchw, params):
    """Pure-JAX reference (independent of the kernel's layout / tap decomposition)."""
    x = jnp.transpose(x_nchw, (0, 2, 3, 1)).astype(jnp.float32)      # NHWC
    C = x.shape[-1]
    w_hwio = params["w2"].reshape(3, 3, C, -1)
    conv2 = lax.conv_general_dilated(
        x, w_hwio, window_strides=(1, 1), padding="SAME",
        dimension_numbers=("NHWC", "HWIO", "NHWC")) + params["b2"]
    mean = jnp.mean(conv2, axis=(0, 1, 2), keepdims=True)
    var = jnp.mean((conv2 - mean) ** 2, axis=(0, 1, 2), keepdims=True)
    bn2 = (conv2 - mean) * lax.rsqrt(var + BN_EPS) * params["g2"] + params["beta2"]
    return jnp.transpose(x + bn2, (0, 3, 1, 2))                      # back to NCHW


def init_params(key, ch_in, ch_out):
    # The reference forward applies conv2 (expects ch_out input channels) directly
    # to x, so the module only runs when ch_in == ch_out (and `extra` is identity).
    assert ch_in == ch_out, "ResBlk.forward only runs with ch_in == ch_out"
    ks = jax.random.split(key, 6)
    params = dict(
        # conv1/bn1 parameters exist in __init__ but their output is dead in forward().
        w1=jax.random.normal(ks[0], (9, ch_in, ch_out), jnp.float32) * 0.1,
        b1=jax.random.normal(ks[1], (ch_out,), jnp.float32) * 0.1,
        g1=jnp.ones((ch_out,), jnp.float32),
        beta1=jnp.zeros((ch_out,), jnp.float32),
        # conv2 weights stored as (tap=dy*3+dx, cin, cout); bias/BN2 params per channel.
        w2=jax.random.normal(ks[2], (9, ch_out, ch_out), jnp.float32) * 0.1,
        b2=jax.random.normal(ks[3], (ch_out,), jnp.float32) * 0.1,
        g2=1.0 + jax.random.normal(ks[4], (ch_out,), jnp.float32) * 0.1,
        beta2=jax.random.normal(ks[5], (ch_out,), jnp.float32) * 0.1,
    )
    return params


if __name__ == "__main__":
    key = jax.random.PRNGKey(0)
    kx, kp = jax.random.split(key)
    ch, H, W, N = 4, 16, 16, 2
    x = jax.random.normal(kx, (N, ch, H, W), jnp.float32)
    params = init_params(kp, ch, ch)

    out = resblk_forward(x, params)
    out = jax.block_until_ready(out)

    ref = resblk_reference(x, params)
    assert out.shape == (N, ch, H, W)
    err = float(jnp.max(jnp.abs(out - ref)))
    assert jnp.allclose(out, ref, atol=1e-3, rtol=1e-3), err
    print("KERNEL_OK")
</pallas_src>

<mosaic_0001>
module attributes {stable_mosaic.version = 11 : i64} {
  func.func @stats_kernel(%arg0: i32, %arg1: memref<1x4x290xf32, #tpu.memory_space<vmem>>, %arg2: memref<9x4x4xf32, #tpu.memory_space<vmem>>, %arg3: memref<2x256xf32, #tpu.memory_space<vmem>>, %arg4: memref<4x2xf32, #tpu.memory_space<vmem>>) attributes {dimension_semantics = [#tpu.dimension_semantics<arbitrary>], iteration_bounds = array<i64: 2>, scalar_prefetch = 0 : i64, scratch_operands = 0 : i64, tpu.core_type = #tpu.core_type<tc>, window_params = [{transform_indices = @transform_0, window_bounds = array<i64: 1, 4, 290>}, {pipeline_mode = #tpu.pipeline_mode<synchronous>, transform_indices = @transform_1, window_bounds = array<i64: 9, 4, 4>}, {pipeline_mode = #tpu.pipeline_mode<synchronous>, transform_indices = @transform_2, window_bounds = array<i64: 2, 256>}, {pipeline_mode = #tpu.pipeline_mode<synchronous>, transform_indices = @transform_3, window_bounds = array<i64: 4, 2>}]} {
    %c0_i32 = arith.constant 0 : i32
    %0 = arith.cmpi eq, %arg0, %c0_i32 : i32
    %1 = arith.extui %0 : i1 to i32
    %c0_i32_0 = arith.constant 0 : i32
    %2 = arith.cmpi ne, %1, %c0_i32_0 : i32
    scf.if %2 {
      %cst_63 = arith.constant 0.000000e+00 : f32
      %83 = vector.broadcast %cst_63 : f32 to vector<4x2xf32>
      %c0_64 = arith.constant 0 : index
      %c0_65 = arith.constant 0 : index
      %84 = vector.load %arg4[%c0_64, %c0_65] : memref<4x2xf32, #tpu.memory_space<vmem>>, vector<4x2xf32>
      tpu.vector_store %arg4[%c0_64, %c0_65], %83 {strides = array<i32>} : memref<4x2xf32, #tpu.memory_space<vmem>>, vector<4x2xf32>,
    } else {
    }
    %c0 = arith.constant 0 : index
    %c0_1 = arith.constant 0 : index
    %3 = vector.load %arg3[%c0, %c0_1] : memref<2x256xf32, #tpu.memory_space<vmem>>, vector<1x256xf32>
    %c1 = arith.constant 1 : index
    %c0_2 = arith.constant 0 : index
    %4 = vector.load %arg3[%c1, %c0_2] : memref<2x256xf32, #tpu.memory_space<vmem>>, vector<1x256xf32>
    %cst = arith.constant 0.000000e+00 : f32
    %5 = vector.broadcast %cst : f32 to vector<4x256xf32>
    %c0_3 = arith.constant 0 : index
    %c0_4 = arith.constant 0 : index
    %c0_5 = arith.constant 0 : index
    %6 = vector.load %arg1[%c0_3, %c0_4, %c0_5] : memref<1x4x290xf32, #tpu.memory_space<vmem>>, vector<1x4x256xf32>
    %7 = vector.shape_cast %6 : vector<1x4x256xf32> to vector<4x256xf32>
    %8 = vector.broadcast %3 : vector<1x256xf32> to vector<4x256xf32>
    %9 = arith.mulf %7, %8 : vector<4x256xf32>
    %c0_6 = arith.constant 0 : index
    %c0_7 = arith.constant 0 : index
    %c0_8 = arith.constant 0 : index
    %10 = vector.load %arg2[%c0_6, %c0_7, %c0_8] : memref<9x4x4xf32, #tpu.memory_space<vmem>>, vector<1x4x4xf32>
    %11 = vector.shape_cast %10 : vector<1x4x4xf32> to vector<4x4xf32>
    %cst_9 = arith.constant dense<0.000000e+00> : vector<4x256xf32>
    %12 = tpu.matmul %11, %9, %cst_9 {dimension_numbers = #tpu.dot_dimension_numbers<[1], [0], [0], [1], [0, 0, 1, 1], [], []>} : vector<4x4xf32>, vector<4x256xf32>, vector<4x256xf32> -> vector<4x256xf32>
    %13 = arith.addf %5, %12 : vector<4x256xf32>
    %c0_10 = arith.constant 0 : index
    %c0_11 = arith.constant 0 : index
    %c1_12 = arith.constant 1 : index
    %14 = vector.load %arg1[%c0_10, %c0_11, %c1_12] : memref<1x4x290xf32, #tpu.memory_space<vmem>>, vector<1x4x256xf32>
    %15 = vector.shape_cast %14 : vector<1x4x256xf32> to vector<4x256xf32>
    %c1_13 = arith.constant 1 : index
    %c0_14 = arith.constant 0 : index
    %c0_15 = arith.constant 0 : index
    %16 = vector.load %arg2[%c1_13, %c0_14, %c0_15] : memref<9x4x4xf32, #tpu.memory_space<vmem>>, vector<1x4x4xf32>
    %17 = vector.shape_cast %16 : vector<1x4x4xf32> to vector<4x4xf32>
    %cst_16 = arith.constant dense<0.000000e+00> : vector<4x256xf32>
    %18 = tpu.matmul %17, %15, %cst_16 {dimension_numbers = #tpu.dot_dimension_numbers<[1], [0], [0], [1], [0, 0, 1, 1], [], []>} : vector<4x4xf32>, vector<4x256xf32>, vector<4x256xf32> -> vector<4x256xf32>
    %19 = arith.addf %13, %18 : vector<4x256xf32>
    %c0_17 = arith.constant 0 : index
    %c0_18 = arith.constant 0 : index
    %c2 = arith.constant 2 : index
    %20 = vector.load %arg1[%c0_17, %c0_18, %c2] : memref<1x4x290xf32, #tpu.memory_space<vmem>>, vector<1x4x256xf32>
    %21 = vector.shape_cast %20 : vector<1x4x256xf32> to vector<4x256xf32>
    %22 = vector.broadcast %4 : vector<1x256xf32> to vector<4x256xf32>
    %23 = arith.mulf %21, %22 : vector<4x256xf32>
    %c2_19 = arith.constant 2 : index
    %c0_20 = arith.constant 0 : index
    %c0_21 = arith.constant 0 : index
    %24 = vector.load %arg2[%c2_19, %c0_20, %c0_21] : memref<9x4x4xf32, #tpu.memory_space<vmem>>, vector<1x4x4xf32>
    %25 = vector.shape_cast %24 : vector<1x4x4xf32> to vector<4x4xf32>
    %cst_22 = arith.constant dense<0.000000e+00> : vector<4x256xf32>
    %26 = tpu.matmul %25, %23, %cst_22 {dimension_numbers = #tpu.dot_dimension_numbers<[1], [0], [0], [1], [0, 0, 1, 1], [], []>} : vector<4x4xf32>, vector<4x256xf32>, vector<4x256xf32> -> vector<4x256xf32>
    %27 = arith.addf %19, %26 : vector<4x256xf32>
    %c0_23 = arith.constant 0 : index
    %c0_24 = arith.constant 0 : index
    %c16 = arith.constant 16 : index
    %28 = vector.load %arg1[%c0_23, %c0_24, %c16] : memref<1x4x290xf32, #tpu.memory_space<vmem>>, vector<1x4x256xf32>
    %29 = vector.shape_cast %28 : vector<1x4x256xf32> to vector<4x256xf32>
    %30 = vector.broadcast %3 : vector<1x256xf32> to vector<4x256xf32>
    %31 = arith.mulf %29, %30 : vector<4x256xf32>
    %c3 = arith.constant 3 : index
    %c0_25 = arith.constant 0 : index
    %c0_26 = arith.constant 0 : index
    %32 = vector.load %arg2[%c3, %c0_25, %c0_26] : memref<9x4x4xf32, #tpu.memory_space<vmem>>, vector<1x4x4xf32>
    %33 = vector.shape_cast %32 : vector<1x4x4xf32> to vector<4x4xf32>
    %cst_27 = arith.constant dense<0.000000e+00> : vector<4x256xf32>
    %34 = tpu.matmul %33, %31, %cst_27 {dimension_numbers = #tpu.dot_dimension_numbers<[1], [0], [0], [1], [0, 0, 1, 1], [], []>} : vector<4x4xf32>, vector<4x256xf32>, vector<4x256xf32> -> vector<4x256xf32>
    %35 = arith.addf %27, %34 : vector<4x256xf32>
    %c0_28 = arith.constant 0 : index
    %c0_29 = arith.constant 0 : index
    %c17 = arith.constant 17 : index
    %36 = vector.load %arg1[%c0_28, %c0_29, %c17] : memref<1x4x290xf32, #tpu.memory_space<vmem>>, vector<1x4x256xf32>
    %37 = vector.shape_cast %36 : vector<1x4x256xf32> to vector<4x256xf32>
    %c4 = arith.constant 4 : index
    %c0_30 = arith.constant 0 : index
    %c0_31 = arith.constant 0 : index
    %38 = vector.load %arg2[%c4, %c0_30, %c0_31] : memref<9x4x4xf32, #tpu.memory_space<vmem>>, vector<1x4x4xf32>
    %39 = vector.shape_cast %38 : vector<1x4x4xf32> to vector<4x4xf32>
    %cst_32 = arith.constant dense<0.000000e+00> : vector<4x256xf32>
    %40 = tpu.matmul %39, %37, %cst_32 {dimension_numbers = #tpu.dot_dimension_numbers<[1], [0], [0], [1], [0, 0, 1, 1], [], []>} : vector<4x4xf32>, vector<4x256xf32>, vector<4x256xf32> -> vector<4x256xf32>
    %41 = arith.addf %35, %40 : vector<4x256xf32>
    %c0_33 = arith.constant 0 : index
    %c0_34 = arith.constant 0 : index
    %c18 = arith.constant 18 : index
    %42 = vector.load %arg1[%c0_33, %c0_34, %c18] : memref<1x4x290xf32, #tpu.memory_space<vmem>>, vector<1x4x256xf32>
    %43 = vector.shape_cast %42 : vector<1x4x256xf32> to vector<4x256xf32>
    %44 = vector.broadcast %4 : vector<1x256xf32> to vector<4x256xf32>
    %45 = arith.mulf %43, %44 : vector<4x256xf32>
    %c5 = arith.constant 5 : index
    %c0_35 = arith.constant 0 : index
    %c0_36 = arith.constant 0 : index
    %46 = vector.load %arg2[%c5, %c0_35, %c0_36] : memref<9x4x4xf32, #tpu.memory_space<vmem>>, vector<1x4x4xf32>
    %47 = vector.shape_cast %46 : vector<1x4x4xf32> to vector<4x4xf32>
    %cst_37 = arith.constant dense<0.000000e+00> : vector<4x256xf32>
    %48 = tpu.matmul %47, %45, %cst_37 {dimension_numbers = #tpu.dot_dimension_numbers<[1], [0], [0], [1], [0, 0, 1, 1], [], []>} : vector<4x4xf32>, vector<4x256xf32>, vector<4x256xf32> -> vector<4x256xf32>
    %49 = arith.addf %41, %48 : vector<4x256xf32>
    %c0_38 = arith.constant 0 : index
    %c0_39 = arith.constant 0 : index
    %c32 = arith.constant 32 : index
    %50 = vector.load %arg1[%c0_38, %c0_39, %c32] : memref<1x4x290xf32, #tpu.memory_space<vmem>>, vector<1x4x256xf32>
    %51 = vector.shape_cast %50 : vector<1x4x256xf32> to vector<4x256xf32>
    %52 = vector.broadcast %3 : vector<1x256xf32> to vector<4x256xf32>
    %53 = arith.mulf %51, %52 : vector<4x256xf32>
    %c6 = arith.constant 6 : index
    %c0_40 = arith.constant 0 : index
    %c0_41 = arith.constant 0 : index
    %54 = vector.load %arg2[%c6, %c0_40, %c0_41] : memref<9x4x4xf32, #tpu.memory_space<vmem>>, vector<1x4x4xf32>
    %55 = vector.shape_cast %54 : vector<1x4x4xf32> to vector<4x4xf32>
    %cst_42 = arith.constant dense<0.000000e+00> : vector<4x256xf32>
    %56 = tpu.matmul %55, %53, %cst_42 {dimension_numbers = #tpu.dot_dimension_numbers<[1], [0], [0], [1], [0, 0, 1, 1], [], []>} : vector<4x4xf32>, vector<4x256xf32>, vector<4x256xf32> -> vector<4x256xf32>
    %57 = arith.addf %49, %56 : vector<4x256xf32>
    %c0_43 = arith.constant 0 : index
    %c0_44 = arith.constant 0 : index
    %c33 = arith.constant 33 : index
    %58 = vector.load %arg1[%c0_43, %c0_44, %c33] : memref<1x4x290xf32, #tpu.memory_space<vmem>>, vector<1x4x256xf32>
    %59 = vector.shape_cast %58 : vector<1x4x256xf32> to vector<4x256xf32>
    %c7 = arith.constant 7 : index
    %c0_45 = arith.constant 0 : index
    %c0_46 = arith.constant 0 : index
    %60 = vector.load %arg2[%c7, %c0_45, %c0_46] : memref<9x4x4xf32, #tpu.memory_space<vmem>>, vector<1x4x4xf32>
    %61 = vector.shape_cast %60 : vector<1x4x4xf32> to vector<4x4xf32>
    %cst_47 = arith.constant dense<0.000000e+00> : vector<4x256xf32>
    %62 = tpu.matmul %61, %59, %cst_47 {dimension_numbers = #tpu.dot_dimension_numbers<[1], [0], [0], [1], [0, 0, 1, 1], [], []>} : vector<4x4xf32>, vector<4x256xf32>, vector<4x256xf32> -> vector<4x256xf32>
    %63 = arith.addf %57, %62 : vector<4x256xf32>
    %c0_48 = arith.constant 0 : index
    %c0_49 = arith.constant 0 : index
    %c34 = arith.constant 34 : index
    %64 = vector.load %arg1[%c0_48, %c0_49, %c34] : memref<1x4x290xf32, #tpu.memory_space<vmem>>, vector<1x4x256xf32>
    %65 = vector.shape_cast %64 : vector<1x4x256xf32> to vector<4x256xf32>
    %66 = vector.broadcast %4 : vector<1x256xf32> to vector<4x256xf32>
    %67 = arith.mulf %65, %66 : vector<4x256xf32>
    %c8 = arith.constant 8 : index
    %c0_50 = arith.constant 0 : index
    %c0_51 = arith.constant 0 : index
    %68 = vector.load %arg2[%c8, %c0_50, %c0_51] : memref<9x4x4xf32, #tpu.memory_space<vmem>>, vector<1x4x4xf32>
    %69 = vector.shape_cast %68 : vector<1x4x4xf32> to vector<4x4xf32>
    %cst_52 = arith.constant dense<0.000000e+00> : vector<4x256xf32>
    %70 = tpu.matmul %69, %67, %cst_52 {dimension_numbers = #tpu.dot_dimension_numbers<[1], [0], [0], [1], [0, 0, 1, 1], [], []>} : vector<4x4xf32>, vector<4x256xf32>, vector<4x256xf32> -> vector<4x256xf32>
    %71 = arith.addf %63, %70 : vector<4x256xf32>
    %c0_53 = arith.constant 0 : index
    %c0_54 = arith.constant 0 : index
    %72 = vector.load %arg4[%c0_53, %c0_54] : memref<4x2xf32, #tpu.memory_space<vmem>>, vector<4x1xf32>
    %cst_55 = arith.constant dense<0.000000e+00> : vector<4xf32>
    %73 = vector.multi_reduction <add>, %71, %cst_55 [1] : vector<4x256xf32> to vector<4xf32>
    %74 = vector.shape_cast %73 : vector<4xf32> to vector<4x1xf32>
    %75 = arith.addf %72, %74 : vector<4x1xf32>
    %c0_56 = arith.constant 0 : index
    %c0_57 = arith.constant 0 : index
    %76 = vector.load %arg4[%c0_56, %c0_57] : memref<4x2xf32, #tpu.memory_space<vmem>>, vector<4x1xf32>
    tpu.vector_store %arg4[%c0_56, %c0_57], %75 {strides = array<i32>} : memref<4x2xf32, #tpu.memory_space<vmem>>, vector<4x1xf32>,
    %c0_58 = arith.constant 0 : index
    %c1_59 = arith.constant 1 : index
    %77 = vector.load %arg4[%c0_58, %c1_59] : memref<4x2xf32, #tpu.memory_space<vmem>>, vector<4x1xf32>
    %78 = arith.mulf %71, %71 : vector<4x256xf32>
    %cst_60 = arith.constant dense<0.000000e+00> : vector<4xf32>
    %79 = vector.multi_reduction <add>, %78, %cst_60 [1] : vector<4x256xf32> to vector<4xf32>
    %80 = vector.shape_cast %79 : vector<4xf32> to vector<4x1xf32>
    %81 = arith.addf %77, %80 : vector<4x1xf32>
    %c0_61 = arith.constant 0 : index
    %c1_62 = arith.constant 1 : index
    %82 = vector.load %arg4[%c0_61, %c1_62] : memref<4x2xf32, #tpu.memory_space<vmem>>, vector<4x1xf32>
    tpu.vector_store %arg4[%c0_61, %c1_62], %81 {strides = array<i32>} : memref<4x2xf32, #tpu.memory_space<vmem>>, vector<4x1xf32>,
    return
  }
  func.func @transform_0(%arg0: i32) -> (i32, i32, i32) {
    %c0_i32 = arith.constant 0 : i32
    %c0_i32_0 = arith.constant 0 : i32
    %c0_i32_1 = arith.constant 0 : i32
    return %arg0, %c0_i32, %c0_i32_0 : i32, i32, i32
  }
  func.func @transform_1(%arg0: i32) -> (i32, i32, i32) {
    %c0_i32 = arith.constant 0 : i32
    %c0_i32_0 = arith.constant 0 : i32
    %c0_i32_1 = arith.constant 0 : i32
    %c0_i32_2 = arith.constant 0 : i32
    return %c0_i32, %c0_i32_0, %c0_i32_1 : i32, i32, i32
  }
  func.func @transform_2(%arg0: i32) -> (i32, i32) {
    %c0_i32 = arith.constant 0 : i32
    %c0_i32_0 = arith.constant 0 : i32
    %c0_i32_1 = arith.constant 0 : i32
    return %c0_i32, %c0_i32_0 : i32, i32
  }
  func.func @transform_3(%arg0: i32) -> (i32, i32) {
    %c0_i32 = arith.constant 0 : i32
    %c0_i32_0 = arith.constant 0 : i32
    %c0_i32_1 = arith.constant 0 : i32
    return %c0_i32, %c0_i32_0 : i32, i32
  }
}

</mosaic_0001>

<bundles_post_ra>
// kernel: tpu_custom_call.1
= control target key start
LH: loop header
LB: loop body
LE: loop exit
PB: predicated region body
PF: predicated region fallthrough
CT: control target
= control target key end

     0   :  { %s1257_s12 = smov 0   ;;  %s1411_s0 = inlined_call_operand.vmem [shape: f32[2,4,290], index: 0, kind: input, shape index: {}]   ;;  %s1412_s1 = inlined_call_operand.vmem [shape: f32[9,4,4], index: 1, kind: input, shape index: {}]   ;;  %s1413_s2 = inlined_call_operand.vmem [shape: f32[2,256], index: 2, kind: input, shape index: {}]   ;;  %s1414_s3 = inlined_call_operand.vmem [shape: f32[4,2], index: 3, kind: output, shape index: {}]  }
   0x1 LB: > { %s1129_s13 = sadd.s32 4294967295, %s1220_s12   ;;  %p1132_p0 = scmp.ge.s32.totalorder %s1220_s12, 1  ;;  %s1220_s12 = sphi %s1257_s12, %s13_s12  }
   0x2   : > { %p132_p1 = scmp.lt.s32.totalorder %s1220_s12, 3 }
   0x4   : > { %p133_p2 = pnand %p1132_p0, %p132_p1 }
   0x5   : > { %p151_p3 = scmp.lt.s32.totalorder (!%p133_p2), %s1129_s13, 1  ;;  %p1134_p4 = scmp.ne.s32.totalorder (!%p133_p2), %s1129_s13, 0 }
   0x6   : > { %136 = sbr.rel (%p133_p2) target bundleno = 677 (0x2a5), region = 32 }
   0xd   : > { %s152_s14 = scalar_select %p151_p3, %s1129_s13, 1 }
   0xe   : > { %159 = sbr.rel (%p1134_p4) target bundleno = 21 (0x15), region = 36  ;;  %vm160_vm0 = vcmask (!%p1134_p4), 11264   ;;  %v1222_v0 = vmov (!%p1134_p4), 0.0  }
   0xf   : > { %s1189_s15 = smul.u32 12, %s152_s14  ;;  %161 = vst.msk [vmem:[%s1414_s3] sm:$0xf] (!%p1134_p4), %vm160_vm0, %v1222_v0 }
  0x11   : > { %s1268_s18 = scalar_lea.vmem %s1411_s0, %s1189_s15 }
  0x15 PF: > { %v167_v1 = vlaneseq  ;;  %v1135_v3 = vld [vmem:[%s1413_s2 + $0x1] ss:$2 sm:$0x3]  ;;  %v162_v4 = vld [vmem:[%s1413_s2] ss:$2 sm:$0x3] }
  0x16   : > { %s1223_s25 = smov 18   ;;  %s1224_s26 = smov 2   ;;  %v1282_v13 = vld [vmem:[%s1268_s18] sm:$0xff]  ;;  %v575_v15 = vld [vmem:[%s1268_s18 + $0x8] sm:$0xf]  ;;  %v1230_v17 = vmov 0.0  }
  0x17   : > { %v168_v2 = vshrl.u32 %v167_v1, 7  ;;  %s1225_s27 = smov 32   ;;  %s1226_s28 = smov 16   ;;  %v1288_v14 = vcombine.high %v1282_v13, %v1282_v13  ;;  %v179_v16 = vld [vmem:[%s1268_s18 + $0x8] sm:$0xf]  ;;  %661 = vmatprep.mubr.f32.mxu0 %v1230_v17  ;;  %267 = vmatprep.mubr.f32.mxu1 %v1230_v17  ;;  %vm675_vm1 = vcmask 146432  }
  0x18   : > { %s1227_s29 = smov 34   ;;  %s1228_s30 = smov 111   ;;  %v671_v18 = vld [vmem:[%s1268_s18 + $0x8] sm:$0xf]  ;;  %vm780_vm2 = vcmask 261120   ;;  %vm587_vm3 = vcmask 908288  }
  0x19   : > { %v169_v5 = vsub.s32 0, %v168_v2  ;;  %v173_v6 = vsub.s32 1, %v168_v2  ;;  %s1229_s4 = smov 127   ;;  %v776_v23 = vld [vmem:[%s1268_s18 + $0x8] sm:$0xf]  ;;  %s1231_s5 = smov 110  }
  0x1a   : > { %s1232_s6 = smov 96   ;;  %v355_v34 = vld [vmem:[%s1268_s18 + $0x8] sm:$0xf]  ;;  %vm198_vm4 = vcmask 1043456   ;;  %vm369_vm5 = vcmask 15360   ;;  %vm194_vm6 = vcmask 31744  }
  0x1b   : > { %v360_v7 = vrot.slane %v1135_v3, %v169_v5  ;;  %v364_v8 = vrot.slane %v1135_v3, %v173_v6  ;;  %v170_v9 = vrot.slane %v162_v4, %v169_v5  ;;  %v174_v10 = vrot.slane %v162_v4, %v173_v6  ;;  %v1151_v41 = vld [vmem:[%s1412_s1 + $0x10] sm:$0xf]  ;;  %s1233_s9 = smov 95   ;;  %s1234_s10 = smov 126   ;;  %v1136_v55 = vld [vmem:[%s1412_s1 + $0x4] sm:$0xf] }
  0x1c   : > { %vm191_vm7 = vcmask 1039360   ;;  %vm474_vm8 = vcmask 130048   ;;  %vm981_vm9 = vcmask 277504   ;;  %v881_v60 = vld [vmem:[%s1268_s18 + $0x8] sm:$0xf]  ;;  %s1235_s16 = smov 112  }
  0x1d   : > { %v365_v11 = vcombine.low %v360_v7, %v364_v8  ;;  %v1279_v12 = vcombine.low %v170_v9, %v174_v10  ;;  %v178_v63 = vld [vmem:[%s1412_s1] sm:$0xf]  ;;  %v470_v0 = vld [vmem:[%s1268_s18 + $0x8] sm:$0xf]  ;;  %s1236_s17 = smov 94   ;;  %vm692_vm10 = vcmask 900096  }
  0x1e   : > { %v977_v3 = vld [vmem:[%s1268_s18 + $0x8] sm:$0xf]  ;;  %vm797_vm11 = vcmask 785408   ;;  %vm386_vm12 = vcmask 1031168   ;;  %vm893_vm13 = vcmask 777216   ;;  %vm491_vm14 = vcmask 916480  }
  0x1f   : > { %672 = vrot.lane.b32.xlu0 %v365_v11, %s1223_s25  ;;  %366 = vrot.lane.b32.xlu1 %v365_v11, %s1224_s26  ;;  %v177_v44 = vmul.f32 %v1282_v13, %v1279_v12  ;;  %vm998_vm15 = vcmask 769024   ;;  %vm1088_vm0 = vcmask 3072  }
  0x21   : > { %v275_v52 = vcombine.high %v177_v44, %v177_v44 }
  0x23   : > { %777 = vrot.lane.b32.xlu0 %v1279_v12, %s1225_s27  ;;  %471 = vrot.lane.b32.xlu1 %v1279_v12, %s1226_s28  ;;  %v1155_v12 = vld [vmem:[%s1412_s1 + $0x14] sm:$0xf] }
  0x27   : > { %978 = vrot.lane.b32.xlu0 %v365_v11, %s1227_s29  ;;  %583 = vrot.lane.b32.xlu1 %v1288_v14, %s1228_s30 }
  0x2b   : > { %585 = vrot.lane.b32.xlu0 %v575_v15, %s1228_s30  ;;  %581 = vrot.lane.b32.xlu1 %v1282_v13, %s1228_s30 }
  0x2f   : > { %187 = vrot.lane.b32.xlu0 %v1288_v14, %s1229_s4  ;;  %189 = vrot.lane.b32.xlu1 %v179_v16, %s1229_s4 }
  0x33   : > { %185 = vrot.lane.b32.xlu0 %v1282_v13, %s1229_s4 }
  0x91   : > { %v673_v19 = vpop.permute.xlu0 %672  ;;  %v367_v20 = vpop.permute.xlu1 %366 }
  0x92   : > { %v674_v21 = vrot.slane %v673_v19, 4  ;;  %v368_v35 = vrot.slane %v367_v20, 4 }
  0x94   : > { %v680_v22 = vmul.f32 %v674_v21, %v671_v18  ;;  %v676_v26 = vsel %vm675_vm1, %v674_v21, %v673_v19  ;;  %v374_v42 = vmul.f32 %v368_v35, %v355_v34  ;;  %v370_v45 = vsel %vm369_vm5, %v368_v35, %v367_v20  ;;  %v1159_v20 = vld [vmem:[%s1412_s1 + $0x18] sm:$0xf]  ;;  %v1147_v35 = vld [vmem:[%s1412_s1 + $0xc] sm:$0xf] }
  0x95   : > { %v778_v24 = vpop.permute.xlu0 %777  ;;  %v1300_v25 = vpop.permute.xlu1 %471  ;;  %v679_v30 = vmul.f32 %v676_v26, %v1282_v13  ;;  %v373_v51 = vmul.f32 %v1282_v13, %v370_v45  ;;  %vm1099_vm1 = vcmask 11272  }
  0x96   : > { %v779_v27 = vrot.slane %v778_v24, 4  ;;  %690 = vrot.lane.b32.xlu1 %v680_v22, %s1231_s5  ;;  %v473_v43 = vrot.slane %v1300_v25, 4 }
  0x97   : > { %v685_v36 = vcombine.high %v679_v30, %v679_v30  ;;  %v379_v59 = vcombine.high %v373_v51, %v373_v51 }
  0x98   : > { %v781_v28 = vsel %vm780_vm2, %v779_v27, %v778_v24  ;;  %v785_v29 = vmul.f32 %v779_v27, %v776_v23  ;;  %v475_v49 = vsel %vm474_vm8, %v473_v43, %v1300_v25  ;;  %v479_v2 = vmul.f32 %v473_v43, %v470_v0  ;;  %v1143_v25 = vld [vmem:[%s1412_s1 + $0x8] sm:$0xf] }
  0x99   : > { %v784_v31 = vmul.f32 %v781_v28, %v1282_v13  ;;  %v1304_v32 = vpop.permute.xlu0 %978  ;;  %v584_v33 = vpop.permute.xlu1 %583  ;;  %v478_v56 = vmul.f32 %v1282_v13, %v475_v49 }
  0x9a   : > { %795 = vrot.lane.b32.xlu1 %v785_v29, %s1232_s6  ;;  %v980_v50 = vrot.slane %v1304_v32, 4 }
  0x9b   : > { %791 = vrot.lane.b32.xlu0 %v784_v31, %s1232_s6  ;;  %v790_v53 = vcombine.high %v784_v31, %v784_v31  ;;  %v484_v62 = vcombine.high %v478_v56, %v478_v56 }
  0x9c   : > { %v982_v58 = vsel %vm981_vm9, %v980_v50, %v1304_v32  ;;  %v986_v4 = vmul.f32 %v980_v50, %v977_v3 }
  0x9d   : > { %v586_v37 = vpop.permute.xlu0 %585  ;;  %v582_v38 = vpop.permute.xlu1 %581  ;;  %v985_v61 = vmul.f32 %v982_v58, %v1282_v13 }
  0x9e   : > { %686 = vrot.lane.b32.xlu1 %v679_v30, %s1231_s5  ;;  %v589_v39 = vsel %vm587_vm3, %v584_v33, %v586_v37  ;;  %v588_v40 = vsel %vm587_vm3, %v582_v38, %v584_v33  ;;  %v1163_v30 = vld [vmem:[%s1412_s1 + $0x1c] sm:$0xf] }
  0x9f   : > { %688 = vrot.lane.b32.xlu0 %v685_v36, %s1231_s5  ;;  %1152 = vmatprep.subr.msk.mxu0 %vm198_vm4, %v589_v39  ;;  %v991_v1 = vcombine.high %v985_v61, %v985_v61 }
  0xa0   : > { %1153 = vmatpush1.msk.msra.mxu0 %vm198_vm4, %v588_v40 }
  0xa1   : > { %v188_v46 = vpop.permute.xlu0 %187  ;;  %v190_v47 = vpop.permute.xlu1 %189  ;;  %1154 = vmatmul.mubr.msk.f32.vlgmr.msra.gmra.mrb[0].mxu0 %vm194_vm6, %v1151_v41 }
  0xa2   : > { %889 = vrot.lane.b32.xlu1 %v1288_v14, %s1233_s9  ;;  %v193_v48 = vsel %vm191_vm7, %v188_v46, %v190_v47  ;;  %766 = vmatprep.mubr.f32.mxu0 %v1230_v17 }
  0xa3   : > { %384 = vrot.lane.b32.xlu0 %v374_v42, %s1234_s10  ;;  %1137 = vmatprep.subr.msk.mxu1 %vm198_vm4, %v193_v48 }
  0xa5   : > { %v186_v54 = vpop.permute.xlu0 %185 }
  0xa6   : > { %380 = vrot.lane.b32.xlu1 %v373_v51, %s1234_s10  ;;  %v192_v57 = vsel %vm191_vm7, %v186_v54, %v188_v46 }
  0xa7   : > { %793 = vrot.lane.b32.xlu0 %v790_v53, %s1232_s6  ;;  %1138 = vmatpush1.msk.msra.mxu1 %vm198_vm4, %v192_v57 }
  0xa8   : > { %1139 = vmatmul.mubr.msk.f32.vlgmr.msra.gmra.mrb[0].mxu1 %vm194_vm6, %v1136_v55  ;;  %1140 = vmatprep.subr.msk.mxu1 %vm198_vm4, %v275_v52  ;;  %v1081_v55 = vld [vmem:[%s1414_s3] sm:$0xf] }
  0xa9   : > { %1141 = vmatpush1.msk.msra.mxu1 %vm198_vm4, %v177_v44  ;;  %347 = vmatprep.mubr.f32.mxu1 %v1230_v17 }
  0xaa   : > { %382 = vrot.lane.b32.xlu1 %v379_v59, %s1234_s10 }
  0xab   : > { %891 = vrot.lane.b32.xlu0 %v881_v60, %s1233_s9 }
  0xae   : > { %487 = vrot.lane.b32.xlu1 %v484_v62, %s1235_s16 }
  0xaf   : > { %887 = vrot.lane.b32.xlu0 %v1282_v13, %s1233_s9 }
  0xb0   : > { %1142 = vmatmul.mubr.msk.f32.vlgmr.msra.gmra.mrb[0].mxu1 %vm194_vm6, %v178_v63 }
  0xb1   : > { %460 = vmatprep.mubr.f32.mxu1 %v1230_v17 }
  0xb2   : > { %994 = vrot.lane.b32.xlu1 %v991_v1, %s1236_s17 }
  0xb3   : > { %489 = vrot.lane.b32.xlu0 %v479_v2, %s1235_s16 }
  0xb6   : > { %485 = vrot.lane.b32.xlu1 %v478_v56, %s1235_s16 }
  0xb7   : > { %996 = vrot.lane.b32.xlu0 %v986_v4, %s1236_s17 }
  0xbb   : > { %992 = vrot.lane.b32.xlu0 %v985_v61, %s1236_s17 }
 0x108   : > { %v691_v5 = vpop.permute.xlu1 %690 }
 0x10c   : > { %v796_v6 = vpop.permute.xlu1 %795 }
 0x10d   : > { %v792_v7 = vpop.permute.xlu0 %791 }
 0x110   : > { %v687_v8 = vpop.permute.xlu1 %686 }
 0x111   : > { %v689_v9 = vpop.permute.xlu0 %688 }
 0x112   : > { %v693_v10 = vsel %vm692_vm10, %v687_v8, %v689_v9  ;;  %v694_v11 = vsel %vm692_vm10, %v689_v9, %v691_v5 }
 0x113   : > { %1156 = vmatprep.subr.msk.mxu0 %vm198_vm4, %v694_v11 }
 0x114   : > { %v890_v13 = vpop.permute.xlu1 %889  ;;  %1157 = vmatpush1.msk.msra.mxu0 %vm198_vm4, %v693_v10 }
 0x115   : > { %v385_v14 = vpop.permute.xlu0 %384  ;;  %1158 = vmatmul.mubr.msk.f32.vlgmr.msra.gmra.mrb[0].mxu0 %vm194_vm6, %v1155_v12 }
 0x116   : > { %871 = vmatprep.mubr.f32.mxu0 %v1230_v17 }
 0x118   : > { %v381_v15 = vpop.permute.xlu1 %380 }
 0x119   : > { %v794_v16 = vpop.permute.xlu0 %793 }
 0x11a   : > { %v798_v18 = vsel %vm797_vm11, %v792_v7, %v794_v16  ;;  %v799_v19 = vsel %vm797_vm11, %v794_v16, %v796_v6 }
 0x11b   : > { %1160 = vmatprep.subr.msk.mxu0 %vm198_vm4, %v799_v19 }
 0x11c   : > { %v383_v21 = vpop.permute.xlu1 %382  ;;  %1161 = vmatpush1.msk.msra.mxu0 %vm198_vm4, %v798_v18 }
 0x11d   : > { %v387_v22 = vsel %vm386_vm12, %v381_v15, %v383_v21  ;;  %v388_v23 = vsel %vm386_vm12, %v383_v21, %v385_v14  ;;  %v892_v24 = vpop.permute.xlu0 %891  ;;  %1162 = vmatmul.mubr.msk.f32.vlgmr.msra.gmra.mrb[0].mxu0 %vm194_vm6, %v1159_v20 }
 0x11e   : > { %v895_v26 = vsel %vm893_vm13, %v890_v13, %v892_v24  ;;  %1144 = vmatprep.subr.msk.mxu1 %vm198_vm4, %v388_v23  ;;  %967 = vmatprep.mubr.f32.mxu0 %v1230_v17 }
 0x11f   : > { %1145 = vmatpush1.msk.msra.mxu1 %vm198_vm4, %v387_v22  ;;  %1164 = vmatprep.subr.msk.mxu0 %vm198_vm4, %v895_v26 }
 0x120   : > { %v488_v27 = vpop.permute.xlu1 %487  ;;  %1146 = vmatmul.mubr.msk.f32.vlgmr.msra.gmra.mrb[0].mxu1 %vm194_vm6, %v1143_v25 }
 0x121   : > { %v888_v28 = vpop.permute.xlu0 %887  ;;  %565 = vmatprep.mubr.f32.mxu1 %v1230_v17 }
 0x122   : > { %v894_v29 = vsel %vm893_vm13, %v888_v28, %v890_v13 }
 0x123   : > { %1165 = vmatpush1.msk.msra.mxu0 %vm198_vm4, %v894_v29 }
 0x124   : > { %v995_v31 = vpop.permute.xlu1 %994 }
 0x125   : > { %v490_v32 = vpop.permute.xlu0 %489  ;;  %1166 = vmatmul.mubr.msk.f32.vlgmr.msra.gmra.mrb[0].mxu0 %vm194_vm6, %v1163_v30 }
 0x126   : > { %v493_v33 = vsel %vm491_vm14, %v488_v27, %v490_v32  ;;  %1072 = vmatprep.mubr.f32.mxu0 %v1230_v17  ;;  %v1167_v17 = vld [vmem:[%s1412_s1 + $0x20] sm:$0xf] }
 0x127   : > { %1148 = vmatprep.subr.msk.mxu1 %vm198_vm4, %v493_v33 }
 0x128   : > { %v486_v34 = vpop.permute.xlu1 %485 }
 0x129   : > { %v492_v36 = vsel %vm491_vm14, %v486_v34, %v488_v27  ;;  %v997_v37 = vpop.permute.xlu0 %996 }
 0x12a   : > { %v1000_v38 = vsel %vm998_vm15, %v995_v31, %v997_v37  ;;  %1149 = vmatpush1.msk.msra.mxu1 %vm198_vm4, %v492_v36 }
 0x12b   : > { %1150 = vmatmul.mubr.msk.f32.vlgmr.msra.gmra.mrb[0].mxu1 %vm194_vm6, %v1147_v35  ;;  %1168 = vmatprep.subr.msk.mxu0 %vm198_vm4, %v1000_v38 }
 0x12d   : > { %v993_v39 = vpop.permute.xlu0 %992 }
 0x12e   : > { %v999_v40 = vsel %vm998_vm15, %v993_v39, %v995_v31 }
 0x12f   : > { %1169 = vmatpush1.msk.msra.mxu0 %vm198_vm4, %v999_v40 }
 0x130   : > { %1170 = vmatmul.mubr.msk.f32.vlgmr.msra.gmra.mrb[0].mxu0 %vm194_vm6, %v1167_v17 }
 0x1fe   : > { %v567_v41 = vpop.f32.mrb[0].mxu1 }
 0x1ff   : > { %v569_v42 = vpop.f32.mrb[1].mxu1 }
 0x203   : > { %v1074_v43 = vpop.f32.mrb[0].mxu0 }
 0x204   : > { %v1173_v44 = vadd.f32 %v1074_v43, %v567_v41  ;;  %v1076_v45 = vpop.f32.mrb[1].mxu0 }
 0x205   : > { %v1174_v46 = vadd.f32 %v1076_v45, %v569_v42 }
 0x206   : > { %v1091_v47 = vmul.f32 %v1173_v44, %v1173_v44  ;;  %v1082_v48 = vsel %vm198_vm4, %v1173_v44, 0.0 }
 0x207   : > { %v1092_v49 = vmul.f32 %v1174_v46, %v1174_v46  ;;  %v1083_v50 = vsel %vm198_vm4, %v1174_v46, 0.0 }
 0x208   : > { %v1084_v51 = vadd.f32 %v1083_v50, %v1082_v48  ;;  %v1093_v52 = vsel %vm198_vm4, %v1091_v47, 0.0 }
 0x209   : > { %v1094_v53 = vsel %vm198_vm4, %v1092_v49, 0.0 }
 0x20a   : > { %1085 = vadd.xlane.f32.xlu1 %v1084_v51  ;;  %v1095_v54 = vadd.f32 %v1094_v53, %v1093_v52 }
 0x20c   : > { %1096 = vadd.xlane.f32.xlu0 %v1095_v54 }
 0x297   : > { %v1086_v56 = vpop.xlane.xlu1 %1085 }
 0x298   : > { %v1087_v57 = vadd.f32 %v1086_v56, %v1081_v55 }
 0x299   : > { %v1097_v58 = vpop.xlane.xlu0 %1096 }
 0x29a   : > { %1089 = vst.msk [vmem:[%s1414_s3] sm:$0xf] %vm1088_vm0, %v1087_v57 }
 0x2a1   : > { %v1090_v59 = vld [vmem:[%s1414_s3] sm:$0xf] }
 0x2a2   : > { %v1098_v60 = vadd.f32 %v1097_v58, %v1090_v59 }
 0x2a4   : > { %1100 = vst.msk [vmem:[%s1414_s3] sm:$0xf] %vm1099_vm1, %v1098_v60 }
 0x2a5 PF: > { %s13_s12 = sadd.s32 1, %s1220_s12  }
 0x2a6   : > { %p10_p5 = scmp.ge.s32.totalorder %s13_s12, 4  }
 0x2a8   :  { %12 = sbr.rel (!%p10_p5) target bundleno = 1 (0x1), region = 71 }

</bundles_post_ra>
